<compile_context>
chip_gen: v6e
topology: v6e:2x2x1
jax: 0.10.0
libtpu: 0.0.40
codegen_flags: <defaults>
</compile_context>

<pallas_src>
import functools

import jax
import jax.numpy as jnp
from jax.experimental import pallas as pl
from jax.experimental.pallas import tpu as pltpu

BN_EPS = 1e-5


def _round_up(x, m):
    return ((x + m - 1) // m) * m


def _pick_tile(total, unit, max_units):
    """Largest multiple of `unit` that divides `total`, at most max_units*unit."""
    t = total // unit
    for m in range(min(max_units, t), 0, -1):
        if t % m == 0:
            return m * unit
    return unit


def _vmem_capacity_bytes():
    # Generation-aware: 128 MiB on v5e/v6e, 64 MiB per TensorCore on v7x.
    try:
        return int(pltpu.get_tpu_info().vmem_capacity_bytes)
    except Exception:
        return 64 * 1024 * 1024


# ------------- Pass 1: K-tiled matmul + per-channel sum / sum-of-squares -------------
def _matmul_stats_kernel(x_ref, wt_ref, y_ref, sum_ref, ssq_ref, acc_ref):
    # grid = (Cout tiles [parallel], row tiles [arbitrary], Cin tiles [arbitrary])
    i = pl.program_id(1)          # row tile
    k = pl.program_id(2)          # reduction (Cin) tile
    nk = pl.num_programs(2)

    @pl.when(jnp.logical_and(i == 0, k == 0))
    def _():
        sum_ref[...] = jnp.zeros_like(sum_ref)
        ssq_ref[...] = jnp.zeros_like(ssq_ref)

    @pl.when(k == 0)
    def _():
        acc_ref[...] = jnp.zeros_like(acc_ref)

    # Native-dtype operands straight into the MXU, f32 accumulation.
    acc_ref[...] += jnp.dot(x_ref[...], wt_ref[...],
                            preferred_element_type=jnp.float32)

    @pl.when(k == nk - 1)
    def _():
        y = acc_ref[...]
        # No bias + zero row/channel padding -> pad rows contribute exactly 0,
        # so the batch statistics need no masking.
        sum_ref[...] += jnp.sum(y, axis=0, keepdims=True)
        ssq_ref[...] += jnp.sum(y * y, axis=0, keepdims=True)
        y_ref[...] = y.astype(y_ref.dtype)


# ------------- Pass 2: streaming y * scale + shift (+ optional activation) -------------
def _bn_apply_kernel(y_ref, scale_ref, shift_ref, o_ref, *, act):
    out = y_ref[...].astype(jnp.float32) * scale_ref[...] + shift_ref[...]
    if act == "relu":
        out = jnp.maximum(out, 0.0)
    # act is None -> identity (module default)
    o_ref[...] = out.astype(o_ref.dtype)


def linear_bn(x, weight, bias, gamma, beta, act=None, *,
              operand_dtype=None, y_dtype=None):
    """x: (..., Cin) -> (..., Cout); BN over all flattened leading dims (training mode).

    operand_dtype: optional dtype for the MXU operands (e.g. jnp.bfloat16 halves
        x/W DMA bytes and uses the fast MXU path; default keeps input dtype).
    y_dtype: optional dtype for the inter-pass y intermediate (bf16 halves the
        dominant HBM roundtrip if tolerance allows; default keeps input dtype
        so the output also aliases the intermediate buffer).
    """
    orig_shape = x.shape
    cin = orig_shape[-1]
    cout = weight.shape[0]
    x2d = x.reshape(-1, cin)
    n = x2d.shape[0]
    out_dtype = x.dtype

    if n == 0:
        # BN over an empty batch is undefined; return an empty result instead
        # of dividing by zero.
        return jnp.zeros(orig_shape[:-1] + (cout,), out_dtype)

    op_dtype = jnp.dtype(operand_dtype) if operand_dtype is not None else jnp.dtype(x.dtype)
    y_dt = jnp.dtype(y_dtype) if y_dtype is not None else jnp.dtype(out_dtype)

    # ---- generation-aware sizing ----
    vmem_cap = _vmem_capacity_bytes()
    vmem_limit = int(min(vmem_cap * 3 // 4, 96 * 1024 * 1024))
    tm_max = 1024 if vmem_cap >= (100 << 20) else 512

    cin_p = _round_up(cin, 128)
    cout_p = _round_up(cout, 128)
    tm = min(tm_max, _round_up(n, 16))   # row tile (sublane-pack friendly for f32/bf16)
    n_pad = _round_up(n, tm)
    n_tiles = n_pad // tm
    tn = _pick_tile(cout_p, 128, 4)      # <= 512, divides cout_p
    tk = _pick_tile(cin_p, 128, 4)       # <= 512, divides cin_p
    j_tiles = cout_p // tn
    k_tiles = cin_p // tk

    # ---- one-time layout prep (skipped when already lane/tile aligned) ----
    x_p = x2d.astype(op_dtype)
    if n_pad != n or cin_p != cin:
        x_p = jnp.pad(x_p, ((0, n_pad - n), (0, cin_p - cin)))
    wt_p = weight.T.astype(op_dtype)                 # pre-transposed: (Cin, Cout)
    if cin_p != cin or cout_p != cout:
        wt_p = jnp.pad(wt_p, ((0, cin_p - cin), (0, cout_p - cout)))
    g_p = gamma.astype(jnp.float32)
    be_p = beta.astype(jnp.float32)
    if cout_p != cout:
        g_p = jnp.pad(g_p, (0, cout_p - cout), constant_values=1.0)
        be_p = jnp.pad(be_p, (0, cout_p - cout))
    g_p = g_p.reshape(1, cout_p)
    be_p = be_p.reshape(1, cout_p)

    x_item = jnp.dtype(op_dtype).itemsize
    y_item = jnp.dtype(y_dt).itemsize
    o_item = jnp.dtype(out_dtype).itemsize

    # ---- Pass 1: matmul + per-channel sum / sum-of-squares ----
    y_p, ch_sum, ch_ssq = pl.pallas_call(
        _matmul_stats_kernel,
        out_shape=(
            jax.ShapeDtypeStruct((n_pad, cout_p), y_dt),
            jax.ShapeDtypeStruct((1, cout_p), jnp.float32),
            jax.ShapeDtypeStruct((1, cout_p), jnp.float32),
        ),
        grid=(j_tiles, n_tiles, k_tiles),
        in_specs=[
            pl.BlockSpec((tm, tk), lambda j, i, k: (i, k)),
            pl.BlockSpec((tk, tn), lambda j, i, k: (k, j)),
        ],
        out_specs=(
            pl.BlockSpec((tm, tn), lambda j, i, k: (i, j)),
            pl.BlockSpec((1, tn), lambda j, i, k: (0, j)),
            pl.BlockSpec((1, tn), lambda j, i, k: (0, j)),
        ),
        scratch_shapes=[pltpu.VMEM((tm, tn), jnp.float32)],
        compiler_params=pltpu.CompilerParams(
            # Cout axis is parallel (megacore-shardable on v7x); rows and K are
            # reduction axes for the resident stat accumulators / y accumulator.
            dimension_semantics=("parallel", "arbitrary", "arbitrary"),
            vmem_limit_bytes=vmem_limit,
        ),
        cost_estimate=pl.CostEstimate(
            flops=2 * n_pad * cin_p * cout_p,
            transcendentals=0,
            bytes_accessed=(j_tiles * n_pad * cin_p * x_item
                            + n_tiles * cin_p * cout_p * x_item
                            + n_pad * cout_p * y_item),
        ),
    )(x_p, wt_p)

    # ---- Finalize batch stats (biased variance), fold BN into scale/shift ----
    # Tiny (1, Cout) op done once here instead of per row-tile in pass 2.
    # The linear bias shifts the batch mean by exactly `bias`, so it cancels in
    # training-mode BN output and is never added on the hot path.
    # TODO(synk): BatchNorm1d running_mean/running_var (eval mode) buffers are
    # not produced; the bias would need to be reinstated for running_mean.
    inv_n = jnp.float32(1.0 / n)
    mean = ch_sum * inv_n
    # NOTE: E[y^2]-E[y]^2 in f32 can lose precision when |mean| >> std; clamped.
    var = jnp.maximum(ch_ssq * inv_n - mean * mean, 0.0)
    scale = g_p * jax.lax.rsqrt(var + BN_EPS)
    shift = be_p - mean * scale

    # ---- Pass 2: normalize + affine (+ activation), parallel over tiles ----
    alias = {0: 0} if y_dt == jnp.dtype(out_dtype) else {}
    out_p = pl.pallas_call(
        functools.partial(_bn_apply_kernel, act=act),
        out_shape=jax.ShapeDtypeStruct((n_pad, cout_p), out_dtype),
        grid=(n_tiles, j_tiles),
        in_specs=[
            pl.BlockSpec((tm, tn), lambda i, j: (i, j)),
            pl.BlockSpec((1, tn), lambda i, j: (0, j)),
            pl.BlockSpec((1, tn), lambda i, j: (0, j)),
        ],
        out_specs=pl.BlockSpec((tm, tn), lambda i, j: (i, j)),
        input_output_aliases=alias,   # reuse the y buffer in place when dtypes match
        compiler_params=pltpu.CompilerParams(
            dimension_semantics=("parallel", "parallel"),
            vmem_limit_bytes=vmem_limit,
        ),
        cost_estimate=pl.CostEstimate(
            flops=2 * n_pad * cout_p,
            transcendentals=0,
            bytes_accessed=n_pad * cout_p * (y_item + o_item),
        ),
    )(y_p, scale, shift)

    out = out_p
    if n_pad != n or cout_p != cout:
        out = out_p[:n, :cout]
    return out.reshape(orig_shape[:-1] + (cout,))


if __name__ == "__main__":
    key = jax.random.PRNGKey(0)
    k_x, k_w, k_b = jax.random.split(key, 3)

    batch, seq, in_channel, out_channel = 2, 8, 32, 64

    # Deterministic parameter init (shapes per nn.Linear / nn.BatchNorm1d).
    bound = 1.0 / (in_channel ** 0.5)
    weight = jax.random.uniform(k_w, (out_channel, in_channel),
                                minval=-bound, maxval=bound, dtype=jnp.float32)
    bias = jax.random.uniform(k_b, (out_channel,),
                              minval=-bound, maxval=bound, dtype=jnp.float32)
    gamma = jnp.ones((out_channel,), jnp.float32)   # BN weight default
    beta = jnp.zeros((out_channel,), jnp.float32)   # BN bias default

    x = jax.random.normal(k_x, (batch, seq, in_channel), dtype=jnp.float32)

    out = linear_bn(x, weight, bias, gamma, beta, act=None)
    out = jax.block_until_ready(out)

    # Pure-JAX reference of the module's training-mode semantics.
    y_ref = x.reshape(-1, in_channel) @ weight.T + bias
    m = y_ref.mean(axis=0, keepdims=True)
    v = ((y_ref - m) ** 2).mean(axis=0, keepdims=True)
    ref = ((y_ref - m) / jnp.sqrt(v + BN_EPS)) * gamma + beta
    ref = ref.reshape(batch, seq, out_channel)
    assert jnp.allclose(out, ref, atol=1e-4, rtol=1e-4), "mismatch vs reference"

    print("KERNEL_OK")
</pallas_src>

<mosaic_0001>
module attributes {stable_mosaic.version = 11 : i64} {
  func.func @_matmul_stats_kernel(%arg0: i32, %arg1: i32, %arg2: i32, %arg3: memref<16x128xf32, #tpu.memory_space<vmem>>, %arg4: memref<128x128xf32, #tpu.memory_space<vmem>>, %arg5: memref<16x128xf32, #tpu.memory_space<vmem>>, %arg6: memref<1x128xf32, #tpu.memory_space<vmem>>, %arg7: memref<1x128xf32, #tpu.memory_space<vmem>>, %arg8: memref<16x128xf32, #tpu.memory_space<vmem>>) attributes {dimension_semantics = [#tpu.dimension_semantics<parallel>, #tpu.dimension_semantics<arbitrary>, #tpu.dimension_semantics<arbitrary>], iteration_bounds = array<i64: 1, 1, 1>, scalar_prefetch = 0 : i64, scratch_operands = 1 : i64, tpu.core_type = #tpu.core_type<tc>, window_params = [{transform_indices = @transform_0, window_bounds = array<i64: 16, 128>}, {transform_indices = @transform_1, window_bounds = array<i64: 128, 128>}, {transform_indices = @transform_2, window_bounds = array<i64: 16, 128>}, {transform_indices = @transform_3, window_bounds = array<i64: 1, 128>}, {transform_indices = @transform_4, window_bounds = array<i64: 1, 128>}]} {
    %c0_i32 = arith.constant 0 : i32
    %0 = arith.cmpi eq, %arg1, %c0_i32 : i32
    %c0_i32_0 = arith.constant 0 : i32
    %1 = arith.cmpi eq, %arg2, %c0_i32_0 : i32
    %2 = arith.andi %0, %1 : i1
    %3 = arith.extui %2 : i1 to i32
    %c0_i32_1 = arith.constant 0 : i32
    %4 = arith.cmpi ne, %3, %c0_i32_1 : i32
    scf.if %4 {
      %cst_13 = arith.constant 0.000000e+00 : f32
      %17 = vector.broadcast %cst_13 : f32 to vector<1x128xf32>
      %c0_14 = arith.constant 0 : index
      %c0_15 = arith.constant 0 : index
      %18 = vector.load %arg6[%c0_14, %c0_15] : memref<1x128xf32, #tpu.memory_space<vmem>>, vector<1x128xf32>
      tpu.vector_store %arg6[%c0_14, %c0_15], %17 {strides = array<i32>} : memref<1x128xf32, #tpu.memory_space<vmem>>, vector<1x128xf32>,
      %cst_16 = arith.constant 0.000000e+00 : f32
      %19 = vector.broadcast %cst_16 : f32 to vector<1x128xf32>
      %c0_17 = arith.constant 0 : index
      %c0_18 = arith.constant 0 : index
      %20 = vector.load %arg7[%c0_17, %c0_18] : memref<1x128xf32, #tpu.memory_space<vmem>>, vector<1x128xf32>
      tpu.vector_store %arg7[%c0_17, %c0_18], %19 {strides = array<i32>} : memref<1x128xf32, #tpu.memory_space<vmem>>, vector<1x128xf32>,
    } else {
    }
    %c0_i32_2 = arith.constant 0 : i32
    %5 = arith.cmpi eq, %arg2, %c0_i32_2 : i32
    %6 = arith.extui %5 : i1 to i32
    %c0_i32_3 = arith.constant 0 : i32
    %7 = arith.cmpi ne, %6, %c0_i32_3 : i32
    scf.if %7 {
      %cst_13 = arith.constant 0.000000e+00 : f32
      %17 = vector.broadcast %cst_13 : f32 to vector<16x128xf32>
      %c0_14 = arith.constant 0 : index
      %c0_15 = arith.constant 0 : index
      %18 = vector.load %arg8[%c0_14, %c0_15] : memref<16x128xf32, #tpu.memory_space<vmem>>, vector<16x128xf32>
      tpu.vector_store %arg8[%c0_14, %c0_15], %17 {strides = array<i32>} : memref<16x128xf32, #tpu.memory_space<vmem>>, vector<16x128xf32>,
    } else {
    }
    %c0 = arith.constant 0 : index
    %c0_4 = arith.constant 0 : index
    %8 = vector.load %arg8[%c0, %c0_4] : memref<16x128xf32, #tpu.memory_space<vmem>>, vector<16x128xf32>
    %c0_5 = arith.constant 0 : index
    %c0_6 = arith.constant 0 : index
    %9 = vector.load %arg3[%c0_5, %c0_6] : memref<16x128xf32, #tpu.memory_space<vmem>>, vector<16x128xf32>
    %c0_7 = arith.constant 0 : index
    %c0_8 = arith.constant 0 : index
    %10 = vector.load %arg4[%c0_7, %c0_8] : memref<128x128xf32, #tpu.memory_space<vmem>>, vector<128x128xf32>
    %cst = arith.constant dense<0.000000e+00> : vector<16x128xf32>
    %11 = tpu.matmul %9, %10, %cst {dimension_numbers = #tpu.dot_dimension_numbers<[1], [0], [0], [1], [0, 0, 1, 1], [], []>} : vector<16x128xf32>, vector<128x128xf32>, vector<16x128xf32> -> vector<16x128xf32>
    %12 = arith.addf %8, %11 : vector<16x128xf32>
    %c0_9 = arith.constant 0 : index
    %c0_10 = arith.constant 0 : index
    %13 = vector.load %arg8[%c0_9, %c0_10] : memref<16x128xf32, #tpu.memory_space<vmem>>, vector<16x128xf32>
    tpu.vector_store %arg8[%c0_9, %c0_10], %12 {strides = array<i32>} : memref<16x128xf32, #tpu.memory_space<vmem>>, vector<16x128xf32>,
    %c0_i32_11 = arith.constant 0 : i32
    %14 = arith.cmpi eq, %arg2, %c0_i32_11 : i32
    %15 = arith.extui %14 : i1 to i32
    %c0_i32_12 = arith.constant 0 : i32
    %16 = arith.cmpi ne, %15, %c0_i32_12 : i32
    scf.if %16 {
      %c0_13 = arith.constant 0 : index
      %c0_14 = arith.constant 0 : index
      %17 = vector.load %arg8[%c0_13, %c0_14] : memref<16x128xf32, #tpu.memory_space<vmem>>, vector<16x128xf32>
      %c0_15 = arith.constant 0 : index
      %c0_16 = arith.constant 0 : index
      %18 = vector.load %arg6[%c0_15, %c0_16] : memref<1x128xf32, #tpu.memory_space<vmem>>, vector<1x128xf32>
      %cst_17 = arith.constant dense<0.000000e+00> : vector<128xf32>
      %19 = vector.multi_reduction <add>, %17, %cst_17 [0] : vector<16x128xf32> to vector<128xf32>
      %20 = vector.shape_cast %19 : vector<128xf32> to vector<1x128xf32>
      %21 = arith.addf %18, %20 : vector<1x128xf32>
      %c0_18 = arith.constant 0 : index
      %c0_19 = arith.constant 0 : index
      %22 = vector.load %arg6[%c0_18, %c0_19] : memref<1x128xf32, #tpu.memory_space<vmem>>, vector<1x128xf32>
      tpu.vector_store %arg6[%c0_18, %c0_19], %21 {strides = array<i32>} : memref<1x128xf32, #tpu.memory_space<vmem>>, vector<1x128xf32>,
      %c0_20 = arith.constant 0 : index
      %c0_21 = arith.constant 0 : index
      %23 = vector.load %arg7[%c0_20, %c0_21] : memref<1x128xf32, #tpu.memory_space<vmem>>, vector<1x128xf32>
      %24 = arith.mulf %17, %17 : vector<16x128xf32>
      %cst_22 = arith.constant dense<0.000000e+00> : vector<128xf32>
      %25 = vector.multi_reduction <add>, %24, %cst_22 [0] : vector<16x128xf32> to vector<128xf32>
      %26 = vector.shape_cast %25 : vector<128xf32> to vector<1x128xf32>
      %27 = arith.addf %23, %26 : vector<1x128xf32>
      %c0_23 = arith.constant 0 : index
      %c0_24 = arith.constant 0 : index
      %28 = vector.load %arg7[%c0_23, %c0_24] : memref<1x128xf32, #tpu.memory_space<vmem>>, vector<1x128xf32>
      tpu.vector_store %arg7[%c0_23, %c0_24], %27 {strides = array<i32>} : memref<1x128xf32, #tpu.memory_space<vmem>>, vector<1x128xf32>,
      %c0_25 = arith.constant 0 : index
      %c0_26 = arith.constant 0 : index
      %29 = vector.load %arg5[%c0_25, %c0_26] : memref<16x128xf32, #tpu.memory_space<vmem>>, vector<16x128xf32>
      tpu.vector_store %arg5[%c0_25, %c0_26], %17 {strides = array<i32>} : memref<16x128xf32, #tpu.memory_space<vmem>>, vector<16x128xf32>,
    } else {
    }
    return
  }
  func.func @transform_0(%arg0: i32, %arg1: i32, %arg2: i32) -> (i32, i32) {
    %c0_i32 = arith.constant 0 : i32
    return %arg1, %arg2 : i32, i32
  }
  func.func @transform_1(%arg0: i32, %arg1: i32, %arg2: i32) -> (i32, i32) {
    %c0_i32 = arith.constant 0 : i32
    return %arg2, %arg0 : i32, i32
  }
  func.func @transform_2(%arg0: i32, %arg1: i32, %arg2: i32) -> (i32, i32) {
    %c0_i32 = arith.constant 0 : i32
    return %arg1, %arg0 : i32, i32
  }
  func.func @transform_3(%arg0: i32, %arg1: i32, %arg2: i32) -> (i32, i32) {
    %c0_i32 = arith.constant 0 : i32
    %c0_i32_0 = arith.constant 0 : i32
    return %c0_i32, %arg0 : i32, i32
  }
  func.func @transform_4(%arg0: i32, %arg1: i32, %arg2: i32) -> (i32, i32) {
    %c0_i32 = arith.constant 0 : i32
    %c0_i32_0 = arith.constant 0 : i32
    return %c0_i32, %arg0 : i32, i32
  }
}

</mosaic_0001>

<bundles_post_ra>
// kernel: tpu_custom_call.1
= control target key start
LH: loop header
LB: loop body
LE: loop exit
PB: predicated region body
PF: predicated region fallthrough
CT: control target
= control target key end

     0   :  { %10 = vsyncpa [#allocation4], 0  ;;  %s456_s0 = inlined_call_operand.hbm [shape: f32[16,128], index: 0, kind: input, shape index: {}]   ;;  %s457_s1 = inlined_call_operand.hbm [shape: f32[128,128], index: 1, kind: input, shape index: {}]   ;;  %s458_s2 = inlined_call_operand.hbm [shape: f32[16,128], index: 2, kind: output, shape index: {0}]   ;;  %s459_s3 = inlined_call_operand.hbm [shape: f32[1,128], index: 3, kind: output, shape index: {1}]   ;;  %s460_s4 = inlined_call_operand.hbm [shape: f32[1,128], index: 4, kind: output, shape index: {2}]  }
   0x1   :  { %11 = vsyncpa [#allocation7], 0 }
   0x2   :  { %12 = vsyncpa [#allocation5], 0 }
   0x3   :  { %13 = vsyncpa [#allocation10], 0  ;;  %s399_s15 = smov [#allocation3]  }
   0x4   :  { %s19_s16 = sshll.u32 %s399_s15, 4  ;;  %s20_s16 = int_to_ptr.vmem [resolvable:$true] %s19_s16 }
   0x5   :  { %s299_s17 = scalar_lea.vmem %s20_s16, 256  ;;  %p304_p1 = scmp.lt.s32.totalorder %s20_s16, %s20_s16 }
   0x6   :  { %p300_p0 = scmp.ne.s32.totalorder %s20_s16, %s299_s17  ;;  %p305_p2 = scmp.lt.s32.totalorder %s299_s17, %s299_s17 }
   0x8   :  { %p306_p3 = por %p305_p2, %p304_p1 }
   0xa   :  { %p307_p4 = pnand %p306_p3, %p300_p0 }
   0xc   :  { %310 = shalt.err (!%p307_p4)
}
   0xd   :  { %s400_s18 = smov 128   ;;  %s401_s19 = smov 8  }
   0xe   :  { %25 = dma.hbm_to_vmem [thread:$0]  %s456_s0, 256, %s20_s16, [#allocation4], %s400_s18, %s400_s18, %s401_s19  }
   0xf   :  { %s402_s22 = smov [#allocation6]  }
  0x10   :  { %s31_s23 = sshll.u32 %s402_s22, 4  ;;  %s32_s23 = int_to_ptr.vmem [resolvable:$true] %s31_s23 }
  0x11   :  { %s319_s24 = scalar_lea.vmem %s32_s23, 2048  ;;  %p324_p6 = scmp.lt.s32.totalorder %s32_s23, %s32_s23 }
  0x12   :  { %p320_p5 = scmp.ne.s32.totalorder %s32_s23, %s319_s24  ;;  %p325_p7 = scmp.lt.s32.totalorder %s319_s24, %s319_s24 }
  0x14   :  { %p326_p8 = por %p325_p7, %p324_p6 }
  0x16   :  { %p327_p9 = pnand %p326_p8, %p320_p5 }
  0x18   :  { %330 = shalt.err (!%p327_p9)
}
  0x19   :  { %37 = dma.hbm_to_vmem [thread:$0]  %s457_s1, 2048, %s32_s23, [#allocation7], %s400_s18, %s400_s18, %s401_s19  }
  0x1a   :  { %391 = dma.done.wait [#allocation4], 256  }
  0x1b   :  { %392 = vsyncadd [#allocation4], 4294967040 }
  0x1c   :  { %393 = dma.done.wait [#allocation7], 2048  }
  0x1d   :  { %394 = vsyncadd [#allocation7], 4294965248  ;;  %v76_v0 = vld [vmem:[#allocation6 + $0x78] sm:$0xff]  ;;  %v75_v1 = vld [vmem:[#allocation6 + $0x70] sm:$0xff]  ;;  %v403_v18 = vmov 0.0   ;;  %s404_s0 = smov [#allocation8]  }
  0x1e   :  { %248 = vmatprep.subr.mxu0 %v76_v0  ;;  %v74_v2 = vld [vmem:[#allocation6 + $0x68] sm:$0xff]  ;;  %v73_v3 = vld [vmem:[#allocation6 + $0x60] sm:$0xff]  ;;  %v59_v4 = vld [vmem:[#allocation3] sm:$0xff]  ;;  %50 = vst [vmem:[#allocation9] sm:$0x1] %v403_v18  ;;  %s190_s1 = sshll.u32 %s404_s0, 4  ;;  %s191_s1 = int_to_ptr.vmem [resolvable:$true] %s190_s1 }
  0x1f   :  { %249 = vmatpush3.msra.mxu0 %v76_v0  ;;  %v72_v5 = vld [vmem:[#allocation6 + $0x58] sm:$0xff]  ;;  %280 = vmatprep.mubr.f32.mxu0 %v59_v4  ;;  %v71_v6 = vld [vmem:[#allocation6 + $0x50] sm:$0xff]  ;;  %v70_v7 = vld [vmem:[#allocation6 + $0x48] sm:$0xff]  ;;  %51 = vst [vmem:[#allocation11] sm:$0x1] %v403_v18  ;;  %s331_s27 = scalar_lea.vmem %s191_s1, 256  ;;  %p336_p11 = scmp.lt.s32.totalorder %s191_s1, %s191_s1 }
  0x20   :  { %250 = vmatprep.subr.mxu0 %v75_v1  ;;  %v69_v8 = vld [vmem:[#allocation6 + $0x40] sm:$0xff]  ;;  %v68_v9 = vld [vmem:[#allocation6 + $0x38] sm:$0xff]  ;;  %v67_v10 = vld [vmem:[#allocation6 + $0x30] sm:$0xff]  ;;  %p332_p10 = scmp.ne.s32.totalorder %s191_s1, %s331_s27  ;;  %p337_p12 = scmp.lt.s32.totalorder %s331_s27, %s331_s27 }
  0x21   :  { %251 = vmatpush3.msra.mxu0 %v75_v1  ;;  %v66_v11 = vld [vmem:[#allocation6 + $0x28] sm:$0xff]  ;;  %v65_v12 = vld [vmem:[#allocation6 + $0x20] sm:$0xff]  ;;  %v64_v13 = vld [vmem:[#allocation6 + $0x18] sm:$0xff] }
  0x22   :  { %252 = vmatprep.subr.mxu0 %v74_v2  ;;  %v63_v14 = vld [vmem:[#allocation6 + $0x10] sm:$0xff]  ;;  %v62_v15 = vld [vmem:[#allocation6 + $0x8] sm:$0xff]  ;;  %v61_v16 = vld [vmem:[#allocation6] sm:$0xff]  ;;  %p338_p13 = por %p337_p12, %p336_p11 }
  0x23   :  { %253 = vmatpush3.msra.mxu0 %v74_v2  ;;  %v60_v17 = vld [vmem:[#allocation3 + $0x8] sm:$0xff] }
  0x24   :  { %254 = vmatprep.subr.mxu0 %v73_v3  ;;  %p339_p0 = pnand %p338_p13, %p332_p10 }
  0x25   :  { %255 = vmatpush3.msra.mxu0 %v73_v3 }
  0x26   :  { %256 = vmatprep.subr.mxu0 %v72_v5 }
  0x27   :  { %257 = vmatpush3.msra.mxu0 %v72_v5 }
  0x28   :  { %258 = vmatprep.subr.mxu0 %v71_v6 }
  0x29   :  { %259 = vmatpush3.msra.mxu0 %v71_v6 }
  0x2a   :  { %260 = vmatprep.subr.mxu0 %v70_v7 }
  0x2b   :  { %261 = vmatpush3.msra.mxu0 %v70_v7 }
  0x2c   :  { %262 = vmatprep.subr.mxu0 %v69_v8 }
  0x2d   :  { %263 = vmatpush3.msra.mxu0 %v69_v8 }
  0x2e   :  { %264 = vmatprep.subr.mxu0 %v68_v9 }
  0x2f   :  { %265 = vmatpush3.msra.mxu0 %v68_v9 }
  0x30   :  { %266 = vmatprep.subr.mxu0 %v67_v10 }
  0x31   :  { %267 = vmatpush3.msra.mxu0 %v67_v10 }
  0x32   :  { %268 = vmatprep.subr.mxu0 %v66_v11 }
  0x33   :  { %269 = vmatpush3.msra.mxu0 %v66_v11 }
  0x34   :  { %270 = vmatprep.subr.mxu0 %v65_v12 }
  0x35   :  { %271 = vmatpush3.msra.mxu0 %v65_v12 }
  0x36   :  { %272 = vmatprep.subr.mxu0 %v64_v13 }
  0x37   :  { %273 = vmatpush3.msra.mxu0 %v64_v13 }
  0x38   :  { %274 = vmatprep.subr.mxu0 %v63_v14 }
  0x39   :  { %275 = vmatpush3.msra.mxu0 %v63_v14 }
  0x3a   :  { %276 = vmatprep.subr.mxu0 %v62_v15 }
  0x3b   :  { %277 = vmatpush3.msra.mxu0 %v62_v15 }
  0x3c   :  { %278 = vmatprep.subr.mxu0 %v61_v16 }
  0x3d   :  { %279 = vmatpush3.msra.mxu0 %v61_v16 }
  0x3e   :  { %281 = vmatmul.mubr.f32.vlgmr.msra.gmra.mxu0 %v60_v17 }
  0xfe   :  { %v282_v19 = vpop.f32.mrf.mxu0 }
  0xff   :  { %184 = vst [vmem:[#allocation8 + $0x8] sm:$0xff] %v282_v19  ;;  %v173_v21 = vmul.f32 %v282_v19, %v282_v19 }
 0x100   :  { %v143_v20 = vpop.f32.mrf.mxu0 }
 0x101   :  { %v162_v22 = vadd.f32 %v282_v19, %v143_v20  ;;  %v172_v23 = vmul.f32 %v143_v20, %v143_v20  ;;  %183 = vst [vmem:[#allocation8] sm:$0xff] %v143_v20 }
 0x102   :  { %342 = shalt.err (!%p339_p0)
}
 0x103   :  { %196 = dma.vmem_to_hbm [thread:$0]  %s191_s1, 256, %s458_s2, [#allocation5], %s400_s18, %s400_s18, %s401_s19   ;;  %v163_v24 = vrot.slane %v162_v22, 4  ;;  %v174_v25 = vadd.f32 %v173_v21, %v172_v23  ;;  %v161_v34 = vld [vmem:[#allocation9] sm:$0x1] }
 0x104   :  { %s405_s30 = smov [#allocation9]   ;;  %v171_v37 = vld [vmem:[#allocation11] sm:$0x1]  ;;  %s406_s6 = smov [#allocation11]  }
 0x105   :  { %v164_v26 = vadd.f32 %v163_v24, %v162_v22  ;;  %v175_v27 = vrot.slane %v174_v25, 4  ;;  %s203_s5 = sshll.u32 %s405_s30, 4  ;;  %s213_s7 = sshll.u32 %s406_s6, 4  ;;  %s204_s5 = int_to_ptr.vmem [resolvable:$true] %s203_s5  ;;  %s214_s7 = int_to_ptr.vmem [resolvable:$true] %s213_s7 }
 0x106   :  { %s351_s2 = scalar_lea.vmem %s204_s5, 16  ;;  %s355_s8 = scalar_lea.vmem %s204_s5, 32 }
 0x107   :  { %v165_v28 = vrot.slane %v164_v26, 2  ;;  %v176_v29 = vadd.f32 %v175_v27, %v174_v25  ;;  %p352_p1 = scmp.ne.s32.totalorder %s204_s5, %s351_s2  ;;  %p356_p2 = scmp.lt.s32.totalorder %s204_s5, %s204_s5 }
 0x108   :  { %p357_p3 = scmp.lt.s32.totalorder %s355_s8, %s351_s2 }
 0x109   :  { %v166_v30 = vadd.f32 %v165_v28, %v164_v26  ;;  %v177_v31 = vrot.slane %v176_v29, 2 }
 0x10a   :  { %p358_p4 = por %p357_p3, %p356_p2 }
 0x10b   :  { %v167_v32 = vrot.slane %v166_v30, 1  ;;  %v178_v33 = vadd.f32 %v177_v31, %v176_v29 }
 0x10c   :  { %p359_p5 = pnand %p358_p4, %p352_p1 }
 0x10d   :  { %v168_v35 = vadd.f32 %v167_v32, %v166_v30  ;;  %v179_v36 = vrot.slane %v178_v33, 1 }
 0x10f   :  { %v180_v38 = vadd.f32 %v179_v36, %v178_v33  ;;  %v169_v39 = vadd.f32 %v168_v35, %v161_v34 }
 0x111   :  { %170 = vst [vmem:[#allocation9] sm:$0x1] %v169_v39  ;;  %v181_v40 = vadd.f32 %v180_v38, %v171_v37 }
 0x112   :  { %362 = shalt.err (!%p359_p5)
}
 0x113   :  { %206 = dma.vmem_to_hbm [thread:$0]  %s204_s5, 16, %s459_s3, [#allocation10]   ;;  %182 = vst [vmem:[#allocation11] sm:$0x1] %v181_v40 }
 0x114   :  { %s371_s11 = scalar_lea.vmem %s214_s7, 16  ;;  %s375_s12 = scalar_lea.vmem %s214_s7, 32 }
 0x115   :  { %p372_p6 = scmp.ne.s32.totalorder %s214_s7, %s371_s11  ;;  %p376_p7 = scmp.lt.s32.totalorder %s214_s7, %s214_s7 }
 0x116   :  { %p377_p8 = scmp.lt.s32.totalorder %s375_s12, %s371_s11 }
 0x118   :  { %p378_p9 = por %p377_p8, %p376_p7 }
 0x11a   :  { %p379_p10 = pnand %p378_p9, %p372_p6 }
 0x11c   :  { %382 = shalt.err (!%p379_p10)
}
 0x11d   :  { %216 = dma.vmem_to_hbm [thread:$0]  %s214_s7, 16, %s460_s4, [#allocation10]  }
 0x11e   :  { %395 = dma.done.wait [#allocation5], 256  }
 0x11f   :  { %396 = vsyncadd [#allocation5], 4294967040 }
 0x120   :  { %397 = dma.done.wait [#allocation10], 32  }
 0x121   :  { %398 = vsyncadd [#allocation10], 4294967264 }
 0x122   :  { %226 = vsyncpa [#allocation4], 1 }
 0x123   :  { %227 = vsyncpa [#allocation7], 1 }
 0x124   :  { %228 = vsyncpa [#allocation5], 1 }
 0x125   :  { %229 = vsyncpa [#allocation10], 1 }

</bundles_post_ra>
